<compile_context>
chip_gen: v5e
topology: v5e:2x2
jax: 0.10.0
libtpu: 0.0.40
codegen_flags: <defaults>
</compile_context>

<pallas_src>
import functools
import warnings

import jax
import jax.numpy as jnp
from jax import lax
from jax.experimental import pallas as pl
from jax.experimental.pallas import tpu as pltpu


def _round_up(x, m):
    return (x + m - 1) // m * m


def _detect_vmem_bytes():
    try:
        return int(pltpu.get_tpu_info().vmem_capacity_bytes)
    except Exception:
        return 64 * 1024 * 1024          # conservative (v7x-sized) fallback


_VMEM_PHYSICAL = _detect_vmem_bytes()
if _VMEM_PHYSICAL >= 100 * 1024 * 1024:  # v5e / v6e: 128 MiB physical VMEM
    _VMEM_LIMIT_BYTES = 96 * 1024 * 1024
    _TILE_VMEM_BUDGET = 56 * 1024 * 1024
    _MAX_TOKEN_TILE = 2048
else:                                    # v7x: 64 MiB physical (or unknown)
    _VMEM_LIMIT_BYTES = 48 * 1024 * 1024
    _TILE_VMEM_BUDGET = 26 * 1024 * 1024
    _MAX_TOKEN_TILE = 1024


# ---------------------------------------------------------------------------
# cos/sin cache construction (mirrors _compute_cos_sin_cache)
# ---------------------------------------------------------------------------
def compute_cos_sin_cache(head_size, rotary_dim, max_position_embeddings, base):
    del head_size
    inv_freq = 1.0 / (
        base ** (jnp.arange(0, rotary_dim, 2, dtype=jnp.float32) / rotary_dim)
    )
    t = jnp.arange(max_position_embeddings, dtype=jnp.float32)
    freqs = jnp.einsum("i,j->ij", t, inv_freq)               # [max_pos, rot/2]
    return jnp.concatenate([jnp.cos(freqs), jnp.sin(freqs)], axis=-1)


# ---------------------------------------------------------------------------
# Pallas kernel
#   prep_ref : neox  -> (tt, rotary_dim)    raw cache rows [cos | sin]
#              gpt-j -> (tt, 2*head_size)   [cos_interleaved | signed_sin_il]
#   q_ref/k_ref/qo_ref/ko_ref : (tt, heads, head_size)
# ---------------------------------------------------------------------------
def _rope_kernel(prep_ref, q_ref, k_ref, qo_ref, ko_ref, *,
                 rotary_dim, head_size, is_neox):
    r2 = rotary_dim // 2

    if is_neox:
        # Build [cos, cos] / [-sin, sin] from the raw [cos | sin] tile.
        # Roll by exactly half the width is direction-agnostic.
        cs = prep_ref[...].astype(jnp.float32)                     # (tt, rd)
        rolled = pltpu.roll(cs, r2, axis=1)                        # [sin | cos]
        lane = lax.broadcasted_iota(jnp.int32, cs.shape, 1)
        first = lane < r2
        cos_w = jnp.where(first, cs, rolled)[:, None, :]           # [cos | cos]
        sin_w = jnp.where(first, -rolled, cs)[:, None, :]          # [-sin| sin]
    else:
        # GPT-J: per-lane interleaved coefficients, tail padded with cos=1 /
        # sin=0 so one full-width FMA also covers partial-rotary models.
        cos_w = prep_ref[:, :head_size].astype(jnp.float32)[:, None, :]
        sin_w = prep_ref[:, head_size:].astype(jnp.float32)[:, None, :]

    def pair_swap(x):
        # out[..., 2i] = x[..., 2i+1]; out[..., 2i+1] = x[..., 2i].
        # Two single-lane rotates + a probe identifying which rotate produced
        # the pair partner -> correct regardless of the rotate direction
        # convention; pure XLU/VPU filler under a memory-bound kernel.
        n = x.shape[-1]
        a = pltpu.roll(x, 1, axis=2)
        b = pltpu.roll(x, n - 1, axis=2)
        lane = lax.broadcasted_iota(jnp.int32, x.shape, 2)
        want = jnp.where(lane % 2 == 0, lane + 1, lane - 1)        # pair partner
        src_a = pltpu.roll(lane.astype(jnp.float32), 1, axis=2)    # source of `a`
        return jnp.where(src_a == want.astype(jnp.float32), a, b)

    def apply(x_ref, o_ref):
        if is_neox:
            if rotary_dim == head_size:
                x = x_ref[...].astype(jnp.float32)
                rot = pltpu.roll(x, r2, axis=2)
                o_ref[...] = (x * cos_w + rot * sin_w).astype(o_ref.dtype)
            else:
                # Partial rotary: roll only the rotary columns (lane-aligned,
                # unmasked stores when rotary_dim % 128 == 0) and copy the
                # pass-through tail with a separate aligned store.
                x = x_ref[:, :, :rotary_dim].astype(jnp.float32)
                rot = pltpu.roll(x, r2, axis=2)
                o_ref[:, :, :rotary_dim] = (x * cos_w + rot * sin_w).astype(
                    o_ref.dtype)
                o_ref[:, :, rotary_dim:] = x_ref[:, :, rotary_dim:]
        else:
            x = x_ref[...].astype(jnp.float32)
            o_ref[...] = (x * cos_w + pair_swap(x) * sin_w).astype(o_ref.dtype)

    apply(q_ref, qo_ref)
    apply(k_ref, ko_ref)


# ---------------------------------------------------------------------------
# Token-tile selection (layout-aware VMEM budget)
# ---------------------------------------------------------------------------
def _select_token_tile(num_tokens, num_heads, num_kv_heads, head_size,
                       in_dtype, prep_width):
    in_bytes = jnp.dtype(in_dtype).itemsize
    # Native sublane packing of the second-to-last block dim: 8 (f32),
    # 16 (bf16), 32 (8-bit).  A (tt, H, head_size) block pads its heads axis
    # up to this, so the budget must use the *padded* head counts.
    sublane = max(8, 32 // max(1, in_bytes))
    hq = _round_up(num_heads, sublane)
    hk = _round_up(num_kv_heads, sublane)
    # Double-buffered in+out block buffers for q/k plus the prep tile.
    per_token_blocks = 2 * ((hq + hk) * head_size * in_bytes * 2
                            + prep_width * 4)
    # Allowance for in-kernel f32 temporaries (loaded tile, rolled copy,
    # FMA result) the compiler keeps in VMEM for large tiles.
    per_token_scratch = 4 * (hq + hk) * head_size * 4
    tt = _TILE_VMEM_BUDGET // (per_token_blocks + per_token_scratch)
    tt = max(8, min(_MAX_TOKEN_TILE, int(tt)))
    if tt >= num_tokens:
        return max(1, num_tokens), 1
    tt = max(8, (tt // 8) * 8)
    return tt, pl.cdiv(num_tokens, tt)


# ---------------------------------------------------------------------------
# Wrapper: tiny cos/sin gather + prep in plain JAX, hot path in Pallas.
# ---------------------------------------------------------------------------
def rotary_embedding(positions, query, key, head_size, cos_sin_cache,
                     is_neox_style=True):
    num_tokens = positions.shape[0]
    rotary_dim = cos_sin_cache.shape[-1]
    r2 = rotary_dim // 2

    cs = cos_sin_cache[positions].astype(jnp.float32)        # (T, rd) gather

    if is_neox_style:
        prep = cs                                            # kernel expands it
    else:
        cos = cs[:, :r2]
        sin = cs[:, r2:]
        cos_il = jnp.repeat(cos, 2, axis=-1)                          # [c0,c0,..]
        sin_il = jnp.stack([-sin, sin], axis=-1).reshape(num_tokens,
                                                         rotary_dim)  # [-s0,s0,..]
        tail = head_size - rotary_dim
        if tail:
            cos_il = jnp.pad(cos_il, ((0, 0), (0, tail)), constant_values=1.0)
            sin_il = jnp.pad(sin_il, ((0, 0), (0, tail)))
        prep = jnp.concatenate([cos_il, sin_il], axis=-1)    # (T, 2*head_size)
    prep_w = prep.shape[-1]

    q = query.reshape(num_tokens, -1, head_size)             # free reshape
    k = key.reshape(num_tokens, -1, head_size)
    num_heads = q.shape[1]
    num_kv_heads = k.shape[1]

    tt, grid_sz = _select_token_tile(num_tokens, num_heads, num_kv_heads,
                                     head_size, query.dtype, prep_w)

    # Pad only the tiny prep array so its 2-D blocks tile it exactly
    # (q/k stay unpadded; their ragged last block is clipped by Pallas).
    t_pad = grid_sz * tt
    if t_pad != num_tokens:
        prep = jnp.pad(prep, ((0, t_pad - num_tokens), (0, 0)))

    kernel = functools.partial(_rope_kernel, rotary_dim=rotary_dim,
                               head_size=head_size, is_neox=is_neox_style)

    in_bytes = jnp.dtype(query.dtype).itemsize
    cost = pl.CostEstimate(
        flops=int(4 * num_tokens * (num_heads + num_kv_heads) * head_size),
        transcendentals=0,
        bytes_accessed=int(2 * (q.size + k.size) * in_bytes + prep.size * 4))

    q_out, k_out = pl.pallas_call(
        kernel,
        out_shape=(
            jax.ShapeDtypeStruct(q.shape, q.dtype),
            jax.ShapeDtypeStruct(k.shape, k.dtype),
        ),
        grid_spec=pltpu.PrefetchScalarGridSpec(
            num_scalar_prefetch=0,
            grid=(grid_sz,),
            in_specs=[
                pl.BlockSpec((tt, prep_w), lambda i: (i, 0)),
                pl.BlockSpec((tt, num_heads, head_size), lambda i: (i, 0, 0)),
                pl.BlockSpec((tt, num_kv_heads, head_size), lambda i: (i, 0, 0)),
            ],
            out_specs=[
                pl.BlockSpec((tt, num_heads, head_size), lambda i: (i, 0, 0)),
                pl.BlockSpec((tt, num_kv_heads, head_size), lambda i: (i, 0, 0)),
            ],
        ),
        compiler_params=pltpu.CompilerParams(
            # Single token axis; "parallel" lets the two v7x TensorCores split
            # the token range for this purely bandwidth-bound op.
            dimension_semantics=("parallel",),
            vmem_limit_bytes=_VMEM_LIMIT_BYTES,
        ),
        input_output_aliases={1: 0, 2: 1},   # q -> q_out, k -> k_out (in place)
        cost_estimate=cost,
    )(prep, q, k)

    return (q_out.reshape(num_tokens, num_heads * head_size),
            k_out.reshape(num_tokens, num_kv_heads * head_size))


# Production entry point: head_size / is_neox_style static, query/key DONATED
# so the HBM aliasing is real (vLLM in-place semantics).  Caller contract:
# query/key must not be used after this call.
rotary_embedding_jit = jax.jit(rotary_embedding, static_argnums=(3, 5),
                               donate_argnums=(1, 2))


# ---------------------------------------------------------------------------
# Pure-JAX reference for correctness checks.
# ---------------------------------------------------------------------------
def rotary_embedding_ref(positions, query, key, head_size, cos_sin_cache,
                         is_neox_style=True):
    num_tokens = positions.shape[0]
    rotary_dim = cos_sin_cache.shape[-1]
    r2 = rotary_dim // 2
    cs = cos_sin_cache[positions]
    cos = cs[:, :r2][:, None, :]
    sin = cs[:, r2:][:, None, :]

    def rot(x):
        x = x.reshape(num_tokens, -1, head_size).astype(jnp.float32)
        if is_neox_style:
            x1 = x[..., :r2]
            x2 = x[..., r2:rotary_dim]
            o1 = x1 * cos - x2 * sin
            o2 = x2 * cos + x1 * sin
            rotated = jnp.concatenate([o1, o2], axis=-1)
        else:
            x1 = x[..., 0:rotary_dim:2]
            x2 = x[..., 1:rotary_dim:2]
            o1 = x1 * cos - x2 * sin
            o2 = x2 * cos + x1 * sin
            rotated = jnp.stack([o1, o2], axis=-1).reshape(
                num_tokens, -1, rotary_dim)
        out = jnp.concatenate([rotated, x[..., rotary_dim:]], axis=-1)
        return out.reshape(num_tokens, -1)

    return rot(query), rot(key)


if __name__ == "__main__":
    warnings.filterwarnings("ignore",
                            message="Some donated buffers were not usable")

    base_key = jax.random.PRNGKey(0)

    def run_case(idx, nt, n_heads, n_kv_heads, head_size, rotary_dim, neox,
                 dtype, atol, rtol):
        kq, kk, kp = jax.random.split(jax.random.fold_in(base_key, idx), 3)
        max_pos = 64
        cache = compute_cos_sin_cache(head_size, rotary_dim, max_pos, 10000)
        query = jax.random.normal(kq, (nt, n_heads * head_size),
                                  dtype=jnp.float32).astype(dtype)
        key = jax.random.normal(kk, (nt, n_kv_heads * head_size),
                                dtype=jnp.float32).astype(dtype)
        positions = jax.random.randint(kp, (nt,), 0, max_pos, dtype=jnp.int32)

        # Pass copies because the jitted wrapper donates query/key.
        q_out, k_out = rotary_embedding_jit(positions, jnp.copy(query),
                                            jnp.copy(key), head_size, cache,
                                            neox)
        q_out = jax.block_until_ready(q_out)
        k_out = jax.block_until_ready(k_out)

        q_ref, k_ref = rotary_embedding_ref(positions, query, key, head_size,
                                            cache, neox)
        assert jnp.allclose(q_out.astype(jnp.float32), q_ref,
                            atol=atol, rtol=rtol)
        assert jnp.allclose(k_out.astype(jnp.float32), k_ref,
                            atol=atol, rtol=rtol)

    # 1. neox style, full rotary, f32
    run_case(0, 16, 4, 2, 128, 128, True, jnp.float32, 2e-5, 2e-5)
    # 2. GPT-J interleaved style (in-kernel lane-pair swizzle), f32
    run_case(1, 16, 4, 2, 128, 128, False, jnp.float32, 2e-5, 2e-5)
    # 3. ragged token count (not a multiple of 8)
    run_case(2, 13, 4, 2, 128, 128, True, jnp.float32, 2e-5, 2e-5)
    # 4. partial rotary (rotary_dim < head_size, lane-aligned), neox
    run_case(3, 16, 2, 1, 256, 128, True, jnp.float32, 2e-5, 2e-5)
    # 5. partial rotary, GPT-J (exercises cos=1 / sin=0 tail padding)
    run_case(4, 16, 2, 1, 256, 128, False, jnp.float32, 2e-5, 2e-5)
    # 6. bf16 activations (exercises (16,128) packing and up/down-cast)
    run_case(5, 16, 4, 2, 128, 128, True, jnp.bfloat16, 5e-2, 2e-2)

    print("KERNEL_OK")
</pallas_src>

<mosaic_0001>
module attributes {stable_mosaic.version = 11 : i64} {
  func.func @_rope_kernel(%arg0: i32, %arg1: memref<16x128xf32, #tpu.memory_space<vmem>>, %arg2: memref<16x4x128xf32, #tpu.memory_space<vmem>>, %arg3: memref<16x2x128xf32, #tpu.memory_space<vmem>>, %arg4: memref<16x4x128xf32, #tpu.memory_space<vmem>>, %arg5: memref<16x2x128xf32, #tpu.memory_space<vmem>>) attributes {dimension_semantics = [#tpu.dimension_semantics<parallel>], iteration_bounds = array<i64: 1>, scalar_prefetch = 0 : i64, scratch_operands = 0 : i64, tpu.core_type = #tpu.core_type<tc>, window_params = [{transform_indices = @transform_0, window_bounds = array<i64: 16, 128>}, {transform_indices = @transform_1, window_bounds = array<i64: 16, 4, 128>}, {transform_indices = @transform_2, window_bounds = array<i64: 16, 2, 128>}, {transform_indices = @transform_3, window_bounds = array<i64: 16, 4, 128>}, {transform_indices = @transform_4, window_bounds = array<i64: 16, 2, 128>}]} {
    %c0 = arith.constant 0 : index
    %c0_0 = arith.constant 0 : index
    %0 = vector.load %arg1[%c0, %c0_0] : memref<16x128xf32, #tpu.memory_space<vmem>>, vector<16x128xf32>
    %c64_i32 = arith.constant 64 : i32
    %1 = tpu.dynamic_rotate %0 by %c64_i32 dim 1 : vector<16x128xf32>, i32 -> vector<16x128xf32>
    %2 = tpu.iota {dimensions = array<i32: 1>} : vector<16x128xi32>
    %c64_i32_1 = arith.constant 64 : i32
    %3 = vector.broadcast %c64_i32_1 : i32 to vector<16x128xi32>
    %4 = arith.cmpi slt, %2, %3 : vector<16x128xi32>
    %5 = arith.select %4, %0, %1 : vector<16x128xi1>, vector<16x128xf32>
    %6 = vector.shape_cast %5 : vector<16x128xf32> to vector<16x1x128xf32>
    %cst = arith.constant 0.000000e+00 : f32
    %7 = vector.broadcast %cst : f32 to vector<16x128xf32>
    %8 = arith.subf %7, %1 : vector<16x128xf32>
    %9 = arith.select %4, %8, %0 : vector<16x128xi1>, vector<16x128xf32>
    %10 = vector.shape_cast %9 : vector<16x128xf32> to vector<16x1x128xf32>
    %c0_2 = arith.constant 0 : index
    %c0_3 = arith.constant 0 : index
    %c0_4 = arith.constant 0 : index
    %11 = vector.load %arg2[%c0_2, %c0_3, %c0_4] : memref<16x4x128xf32, #tpu.memory_space<vmem>>, vector<16x4x128xf32>
    %c64_i32_5 = arith.constant 64 : i32
    %12 = tpu.dynamic_rotate %11 by %c64_i32_5 dim 2 : vector<16x4x128xf32>, i32 -> vector<16x4x128xf32>
    %13 = vector.broadcast %6 : vector<16x1x128xf32> to vector<16x4x128xf32>
    %14 = arith.mulf %11, %13 : vector<16x4x128xf32>
    %15 = vector.broadcast %10 : vector<16x1x128xf32> to vector<16x4x128xf32>
    %16 = arith.mulf %12, %15 : vector<16x4x128xf32>
    %17 = arith.addf %14, %16 : vector<16x4x128xf32>
    %c0_6 = arith.constant 0 : index
    %c0_7 = arith.constant 0 : index
    %c0_8 = arith.constant 0 : index
    %18 = vector.load %arg4[%c0_6, %c0_7, %c0_8] : memref<16x4x128xf32, #tpu.memory_space<vmem>>, vector<16x4x128xf32>
    tpu.vector_store %arg4[%c0_6, %c0_7, %c0_8], %17 {strides = array<i32>} : memref<16x4x128xf32, #tpu.memory_space<vmem>>, vector<16x4x128xf32>,
    %c0_9 = arith.constant 0 : index
    %c0_10 = arith.constant 0 : index
    %c0_11 = arith.constant 0 : index
    %19 = vector.load %arg3[%c0_9, %c0_10, %c0_11] : memref<16x2x128xf32, #tpu.memory_space<vmem>>, vector<16x2x128xf32>
    %c64_i32_12 = arith.constant 64 : i32
    %20 = tpu.dynamic_rotate %19 by %c64_i32_12 dim 2 : vector<16x2x128xf32>, i32 -> vector<16x2x128xf32>
    %21 = vector.broadcast %6 : vector<16x1x128xf32> to vector<16x2x128xf32>
    %22 = arith.mulf %19, %21 : vector<16x2x128xf32>
    %23 = vector.broadcast %10 : vector<16x1x128xf32> to vector<16x2x128xf32>
    %24 = arith.mulf %20, %23 : vector<16x2x128xf32>
    %25 = arith.addf %22, %24 : vector<16x2x128xf32>
    %c0_13 = arith.constant 0 : index
    %c0_14 = arith.constant 0 : index
    %c0_15 = arith.constant 0 : index
    %26 = vector.load %arg5[%c0_13, %c0_14, %c0_15] : memref<16x2x128xf32, #tpu.memory_space<vmem>>, vector<16x2x128xf32>
    tpu.vector_store %arg5[%c0_13, %c0_14, %c0_15], %25 {strides = array<i32>} : memref<16x2x128xf32, #tpu.memory_space<vmem>>, vector<16x2x128xf32>,
    return
  }
  func.func @transform_0(%arg0: i32) -> (i32, i32) {
    %c0_i32 = arith.constant 0 : i32
    %c0_i32_0 = arith.constant 0 : i32
    return %arg0, %c0_i32 : i32, i32
  }
  func.func @transform_1(%arg0: i32) -> (i32, i32, i32) {
    %c0_i32 = arith.constant 0 : i32
    %c0_i32_0 = arith.constant 0 : i32
    %c0_i32_1 = arith.constant 0 : i32
    return %arg0, %c0_i32, %c0_i32_0 : i32, i32, i32
  }
  func.func @transform_2(%arg0: i32) -> (i32, i32, i32) {
    %c0_i32 = arith.constant 0 : i32
    %c0_i32_0 = arith.constant 0 : i32
    %c0_i32_1 = arith.constant 0 : i32
    return %arg0, %c0_i32, %c0_i32_0 : i32, i32, i32
  }
  func.func @transform_3(%arg0: i32) -> (i32, i32, i32) {
    %c0_i32 = arith.constant 0 : i32
    %c0_i32_0 = arith.constant 0 : i32
    %c0_i32_1 = arith.constant 0 : i32
    return %arg0, %c0_i32, %c0_i32_0 : i32, i32, i32
  }
  func.func @transform_4(%arg0: i32) -> (i32, i32, i32) {
    %c0_i32 = arith.constant 0 : i32
    %c0_i32_0 = arith.constant 0 : i32
    %c0_i32_1 = arith.constant 0 : i32
    return %arg0, %c0_i32, %c0_i32_0 : i32, i32, i32
  }
}

</mosaic_0001>

<bundles_post_ra>
// kernel: rotary_embedding.1
= control target key start
LH: loop header
LB: loop body
LE: loop exit
PB: predicated region body
PF: predicated region fallthrough
CT: control target
= control target key end

     0   :  { %s360_s21 = smov 64   ;;  %v22_v36 = vlaneseq  ;;  %s927_s1 = inlined_call_operand.vmem [shape: f32[16,4,128], index: 1, kind: input, shape index: {}, may-alias: {1,3}]   ;;  %s928_s0 = inlined_call_operand.vmem [shape: f32[16,128], index: 0, kind: input, shape index: {}]   ;;  %s929_s2 = inlined_call_operand.vmem [shape: f32[16,2,128], index: 2, kind: input, shape index: {}, may-alias: {2,4}]   ;;  %s930_s3 = inlined_call_operand.vmem [shape: f32[16,4,128], index: 3, kind: output, shape index: {0}, may-alias: {1,3}]   ;;  %s931_s4 = inlined_call_operand.vmem [shape: f32[16,2,128], index: 4, kind: output, shape index: {1}, may-alias: {2,4}]  }
   0x1   :  { %v389_v0 = vld [vmem:[%s927_s1 + $0x8] sm:$0xf]  ;;  %v394_v1 = vld [vmem:[%s927_s1] sm:$0xf]  ;;  %v410_v3 = vld [vmem:[%s927_s1 + $0xc] sm:$0xf] }
   0x2   :  { %v399_v2 = vld [vmem:[%s928_s0] sm:$0xff]  ;;  %83 = vrot.lane.b32.xlu2 %v389_v0, %s360_s21  ;;  %79 = vrot.lane.b32.xlu1 %v394_v1, %s360_s21  ;;  %v420_v5 = vld [vmem:[%s928_s0 + $0x8] sm:$0xff]  ;;  %v23_v38 = vand.u32 127, %v22_v36 }
   0x3   :  { %18 = vrot.lane.b32.xlu0 %v399_v2, %s360_s21  ;;  %v415_v4 = vld [vmem:[%s927_s1 + $0x4] sm:$0xf]  ;;  %v431_v6 = vld [vmem:[%s927_s1 + $0x18] sm:$0xf]  ;;  %v436_v7 = vld [vmem:[%s927_s1 + $0x14] sm:$0xf] }
   0x4   :  { %v441_v8 = vld [vmem:[%s927_s1 + $0x10] sm:$0xf]  ;;  %v452_v9 = vld [vmem:[%s927_s1 + $0x24] sm:$0xf]  ;;  %v457_v10 = vld [vmem:[%s927_s1 + $0x20] sm:$0xf] }
   0x5   :  { %v462_v11 = vld [vmem:[%s927_s1 + $0x1c] sm:$0xf]  ;;  %v473_v12 = vld [vmem:[%s927_s1 + $0x30] sm:$0xf]  ;;  %v478_v13 = vld [vmem:[%s927_s1 + $0x2c] sm:$0xf] }
   0x6   :  { %v483_v14 = vld [vmem:[%s927_s1 + $0x28] sm:$0xf]  ;;  %v494_v15 = vld [vmem:[%s927_s1 + $0x3c] sm:$0xf]  ;;  %v499_v16 = vld [vmem:[%s927_s1 + $0x38] sm:$0xf] }
   0x7   :  { %v504_v17 = vld [vmem:[%s927_s1 + $0x34] sm:$0xf]  ;;  %v515_v18 = vld [vmem:[%s929_s2 + $0x4] sm:$0x3]  ;;  %v520_v19 = vld [vmem:[%s929_s2 + $0x2] sm:$0x3] }
   0x8   :  { %v525_v20 = vld [vmem:[%s929_s2] sm:$0x3]  ;;  %v536_v21 = vld [vmem:[%s929_s2 + $0xa] sm:$0x3]  ;;  %v541_v22 = vld [vmem:[%s929_s2 + $0x8] sm:$0x3] }
   0x9   :  { %v546_v23 = vld [vmem:[%s929_s2 + $0x6] sm:$0x3]  ;;  %v557_v24 = vld [vmem:[%s929_s2 + $0x10] sm:$0x3]  ;;  %v562_v25 = vld [vmem:[%s929_s2 + $0xe] sm:$0x3] }
   0xa   :  { %85 = vrot.lane.b32.xlu2 %v410_v3, %s360_s21  ;;  %81 = vrot.lane.b32.xlu1 %v415_v4, %s360_s21  ;;  %v567_v26 = vld [vmem:[%s929_s2 + $0xc] sm:$0x3]  ;;  %v578_v27 = vld [vmem:[%s929_s2 + $0x16] sm:$0x3]  ;;  %vm24_vm0 = vcmp.lt.s32.totalorder %v23_v38, 64 }
   0xb   :  { %20 = vrot.lane.b32.xlu0 %v420_v5, %s360_s21  ;;  %v583_v28 = vld [vmem:[%s929_s2 + $0x14] sm:$0x3]  ;;  %v588_v29 = vld [vmem:[%s929_s2 + $0x12] sm:$0x3]  ;;  %v599_v30 = vld [vmem:[%s929_s2 + $0x1c] sm:$0x3] }
   0xc   :  { %v604_v31 = vld [vmem:[%s929_s2 + $0x1a] sm:$0x3]  ;;  %v609_v32 = vld [vmem:[%s929_s2 + $0x18] sm:$0x3]  ;;  %v620_v33 = vld [vmem:[%s929_s2 + $0x1e] sm:$0x3] }
   0xd   :  { %939 = vst [vmem:[#allocation2_spill] sm:$0xff] %v609_v32 }
   0xe   :  { %940 = vst [vmem:[#allocation3_spill] sm:$0xff] %v620_v33 }
  0x12   :  { %91 = vrot.lane.b32.xlu2 %v431_v6, %s360_s21  ;;  %89 = vrot.lane.b32.xlu1 %v436_v7, %s360_s21 }
  0x13   :  { %87 = vrot.lane.b32.xlu0 %v441_v8, %s360_s21 }
  0x1a   :  { %97 = vrot.lane.b32.xlu2 %v452_v9, %s360_s21  ;;  %95 = vrot.lane.b32.xlu1 %v457_v10, %s360_s21 }
  0x1b   :  { %93 = vrot.lane.b32.xlu0 %v462_v11, %s360_s21 }
  0x22   :  { %103 = vrot.lane.b32.xlu2 %v473_v12, %s360_s21  ;;  %101 = vrot.lane.b32.xlu1 %v478_v13, %s360_s21 }
  0x23   :  { %99 = vrot.lane.b32.xlu0 %v483_v14, %s360_s21 }
  0x2a   :  { %109 = vrot.lane.b32.xlu2 %v494_v15, %s360_s21  ;;  %107 = vrot.lane.b32.xlu1 %v499_v16, %s360_s21 }
  0x2b   :  { %105 = vrot.lane.b32.xlu0 %v504_v17, %s360_s21 }
  0x32   :  { %259 = vrot.lane.b32.xlu2 %v515_v18, %s360_s21  ;;  %257 = vrot.lane.b32.xlu1 %v520_v19, %s360_s21 }
  0x33   :  { %255 = vrot.lane.b32.xlu0 %v525_v20, %s360_s21 }
  0x3a   :  { %265 = vrot.lane.b32.xlu2 %v536_v21, %s360_s21  ;;  %263 = vrot.lane.b32.xlu1 %v541_v22, %s360_s21 }
  0x3b   :  { %261 = vrot.lane.b32.xlu0 %v546_v23, %s360_s21 }
  0x42   :  { %271 = vrot.lane.b32.xlu2 %v557_v24, %s360_s21  ;;  %269 = vrot.lane.b32.xlu1 %v562_v25, %s360_s21 }
  0x43   :  { %267 = vrot.lane.b32.xlu0 %v567_v26, %s360_s21 }
  0x4a   :  { %277 = vrot.lane.b32.xlu2 %v578_v27, %s360_s21  ;;  %275 = vrot.lane.b32.xlu1 %v583_v28, %s360_s21 }
  0x4b   :  { %273 = vrot.lane.b32.xlu0 %v588_v29, %s360_s21 }
  0x52   :  { %283 = vrot.lane.b32.xlu2 %v599_v30, %s360_s21  ;;  %281 = vrot.lane.b32.xlu1 %v604_v31, %s360_s21 }
  0x53   :  { %279 = vrot.lane.b32.xlu0 %v609_v32, %s360_s21 }
  0x5b   :  { %285 = vrot.lane.b32.xlu0 %v620_v33, %s360_s21 }
  0x5c   :  { %v84_v34 = vpop.permute.xlu2 %83 }
  0x64   :  { %v624_v35 = vpop.permute.xlu2 %85 }
  0x6c   :  { %v626_v37 = vpop.permute.xlu2 %91 }
  0x74   :  { %v628_v39 = vpop.permute.xlu2 %97  ;;  %v630_v40 = vpop.permute.xlu1 %79 }
  0x75   :  { %v19_v41 = vpop.permute.xlu0 %18 }
  0x76   :  { %v634_v42 = vsel %vm24_vm0, %v399_v2, %v19_v41  ;;  %v43_v43 = vsub.f32 0.0, %v19_v41 }
  0x77   :  { %v29_v44 = vrot.slane %v634_v42, 1  ;;  %v30_v45 = vrot.slane %v634_v42, 2  ;;  %v33_v54 = vrot.slane %v634_v42, 5  ;;  %v32_v59 = vrot.slane %v634_v42, 4 }
  0x78   :  { %v640_v46 = vsel %vm24_vm0, %v43_v43, %v399_v2 }
  0x79   :  { %v49_v47 = vrot.slane %v640_v46, 1  ;;  %v643_v48 = vperm.slane %v29_v44, 0  ;;  %v50_v49 = vrot.slane %v640_v46, 2  ;;  %v113_v50 = vperm.slane %v30_v45, 0 }
  0x7a   :  { %v53_v41 = vrot.slane %v640_v46, 5  ;;  %v669_v43 = vperm.slane %v33_v54, 0  ;;  %v52_v44 = vrot.slane %v640_v46, 4 }
  0x7b   :  { %v646_v51 = vperm.slane %v49_v47, 0  ;;  %v651_v55 = vperm.slane %v50_v49, 0  ;;  %v144_v56 = vmul.f32 %v643_v48, %v415_v4  ;;  %v145_v62 = vmul.f32 %v113_v50, %v389_v0 }
  0x7c   :  { %v648_v52 = vpop.permute.xlu2 %103  ;;  %v82_v53 = vpop.permute.xlu1 %81  ;;  %v35_v47 = vrot.slane %v634_v42, 7  ;;  %v679_v49 = vperm.slane %v32_v59, 0  ;;  %v686_v38 = vperm.slane %v53_v41, 0 }
  0x7d   :  { %v192_v57 = vmul.f32 %v646_v51, %v82_v53  ;;  %v21_v58 = vpop.permute.xlu0 %20  ;;  %v193_v63 = vmul.f32 %v651_v55, %v84_v34 }
  0x7e   :  { %v659_v60 = vsel %vm24_vm0, %v420_v5, %v21_v58  ;;  %v44_v61 = vsub.f32 0.0, %v21_v58  ;;  %v55_v58 = vrot.slane %v640_v46, 7 }
  0x7f   :  { %v208_v2 = vadd.f32 %v192_v57, %v144_v56  ;;  %v42_v36 = vrot.slane %v659_v60, 7  ;;  %v209_v45 = vadd.f32 %v193_v63, %v145_v62  ;;  %v148_v56 = vmul.f32 %v669_v43, %v436_v7 }
  0x80   :  { %v667_v4 = vsel %vm24_vm0, %v44_v61, %v420_v5  ;;  %v690_v57 = vperm.slane %v52_v44, 0  ;;  %v935_v7 = vperm.slane %v659_v60, 0 }
  0x81   :  { %224 = vst [vmem:[%s930_s3 + $0x4] sm:$0xf] %v208_v2  ;;  %v62_v0 = vrot.slane %v667_v4, 7  ;;  %v676_v34 = vperm.slane %v42_v36, 0  ;;  %v697_v2 = vperm.slane %v35_v47, 0  ;;  %v147_v36 = vmul.f32 %v679_v49, %v441_v8 }
  0x82   :  { %225 = vst [vmem:[%s930_s3 + $0x8] sm:$0xf] %v209_v45  ;;  %v289_v47 = vmul.f32 %v515_v18, %v113_v50  ;;  %v51_v18 = vrot.slane %v640_v46, 3 }
  0x83   :  { %941 = vst [vmem:[#allocation4_spill] sm:$0xff] %v676_v34  ;;  %v684_v5 = vperm.slane %v62_v0, 0  ;;  %v158_v59 = vmul.f32 %v676_v34, %v494_v15  ;;  %v933_v0 = vperm.slane %v634_v42, 0  ;;  %v31_v15 = vrot.slane %v634_v42, 3 }
  0x84   :  { %v110_v53 = vpop.permute.xlu2 %109  ;;  %v90_v54 = vpop.permute.xlu1 %89  ;;  %v150_v8 = vmul.f32 %v697_v2, %v462_v11 }
  0x85   :  { %942 = vst [vmem:[#allocation5_spill] sm:$0xff] %v684_v5  ;;  %v206_v61 = vmul.f32 %v684_v5, %v110_v53  ;;  %v196_v62 = vmul.f32 %v686_v38, %v90_v54  ;;  %v88_v63 = vpop.permute.xlu0 %87  ;;  %v38_v53 = vrot.slane %v659_v60, 3  ;;  %v712_v54 = vperm.slane %v55_v58, 0 }
  0x86   :  { %v195_v41 = vmul.f32 %v690_v57, %v88_v63  ;;  %v143_v11 = vmul.f32 %v933_v0, %v394_v1  ;;  %v733_v58 = vperm.slane %v31_v15, 0 }
  0x87   :  { %v222_v44 = vadd.f32 %v206_v61, %v158_v59  ;;  %v212_v45 = vadd.f32 %v196_v62, %v148_v56  ;;  %v934_v56 = vperm.slane %v640_v46, 0  ;;  %v151_v59 = vmul.f32 %v935_v7, %v457_v10 }
  0x88   :  { %v211_v33 = vadd.f32 %v195_v41, %v147_v36  ;;  %v167_v61 = vperm.slane %v667_v4, 0  ;;  %v58_v62 = vrot.slane %v667_v4, 3  ;;  %v34_v10 = vrot.slane %v634_v42, 6 }
  0x89   :  { %238 = vst [vmem:[%s930_s3 + $0x3c] sm:$0xf] %v222_v44  ;;  %v191_v50 = vmul.f32 %v934_v56, %v630_v40  ;;  %v736_v41 = vperm.slane %v38_v53, 0  ;;  %v37_v44 = vrot.slane %v659_v60, 2  ;;  %v36_v56 = vrot.slane %v659_v60, 1 }
  0x8a   :  { %228 = vst [vmem:[%s930_s3 + $0x14] sm:$0xf] %v212_v45  ;;  %v739_v45 = vperm.slane %v51_v18, 0  ;;  %v146_v53 = vmul.f32 %v733_v58, %v410_v3  ;;  %v751_v5 = vperm.slane %v34_v10, 0 }
  0x8b   :  { %227 = vst [vmem:[%s930_s3 + $0x10] sm:$0xf] %v211_v33  ;;  %v54_v33 = vrot.slane %v640_v46, 6  ;;  %v207_v15 = vadd.f32 %v191_v50, %v143_v11  ;;  %v56_v11 = vrot.slane %v667_v4, 1 }
  0x8c   :  { %v260_v63 = vpop.permute.xlu2 %259  ;;  %v96_v36 = vpop.permute.xlu1 %95  ;;  %v194_v18 = vmul.f32 %v739_v45, %v624_v35  ;;  %v149_v35 = vmul.f32 %v751_v5, %v431_v6  ;;  %v59_v6 = vrot.slane %v667_v4, 4 }
  0x8d   :  { %v305_v1 = vmul.f32 %v260_v63, %v651_v55  ;;  %v199_v0 = vmul.f32 %v167_v61, %v96_v36  ;;  %v94_v40 = vpop.permute.xlu0 %93  ;;  %223 = vst [vmem:[%s930_s3] sm:$0xf] %v207_v15  ;;  %v756_v55 = vperm.slane %v54_v33, 0  ;;  %v57_v63 = vrot.slane %v667_v4, 2 }
  0x8e   :  { %v198_v7 = vmul.f32 %v712_v54, %v94_v40  ;;  %v760_v36 = vperm.slane %v37_v44, 0  ;;  %v210_v3 = vadd.f32 %v194_v18, %v146_v53  ;;  %v40_v18 = vrot.slane %v659_v60, 5 }
  0x8f   :  { %v321_v34 = vadd.f32 %v305_v1, %v289_v47  ;;  %v215_v32 = vadd.f32 %v199_v0, %v151_v59  ;;  %v197_v0 = vmul.f32 %v756_v55, %v626_v37  ;;  %v769_v47 = vperm.slane %v36_v56, 0 }
  0x90   :  { %v214_v50 = vadd.f32 %v198_v7, %v150_v8  ;;  %v771_v59 = vperm.slane %v56_v11, 0  ;;  %v292_v7 = vmul.f32 %v536_v21, %v669_v43  ;;  %v41_v8 = vrot.slane %v659_v60, 6  ;;  %226 = vst [vmem:[%s930_s3 + $0xc] sm:$0xf] %v210_v3 }
  0x91   :  { %337 = vst [vmem:[%s931_s4 + $0x4] sm:$0x3] %v321_v34  ;;  %v39_v34 = vrot.slane %v659_v60, 4  ;;  %v170_v37 = vperm.slane %v58_v62, 0  ;;  %v213_v56 = vadd.f32 %v197_v0, %v149_v35  ;;  %v152_v10 = vmul.f32 %v769_v47, %v452_v9 }
  0x92   :  { %231 = vst [vmem:[%s930_s3 + $0x20] sm:$0xf] %v215_v32  ;;  %v200_v32 = vmul.f32 %v771_v59, %v628_v39  ;;  %v154_v43 = vmul.f32 %v736_v41, %v478_v13  ;;  %v790_v33 = vperm.slane %v57_v63, 0  ;;  %v797_v62 = vperm.slane %v59_v6, 0 }
  0x93   :  { %230 = vst [vmem:[%s930_s3 + $0x1c] sm:$0xf] %v214_v50  ;;  %v795_v1 = vperm.slane %v39_v34, 0  ;;  %v153_v39 = vmul.f32 %v760_v36, %v483_v14  ;;  %v61_v14 = vrot.slane %v667_v4, 6  ;;  %v60_v35 = vrot.slane %v667_v4, 5 }
  0x94   :  { %v266_v44 = vpop.permute.xlu2 %265  ;;  %v102_v21 = vpop.permute.xlu1 %101  ;;  %229 = vst [vmem:[%s930_s3 + $0x18] sm:$0xf] %v213_v56  ;;  %v216_v13 = vadd.f32 %v200_v32, %v152_v10  ;;  %v288_v4 = vmul.f32 %v520_v19, %v643_v48 }
  0x95   :  { %v308_v9 = vmul.f32 %v266_v44, %v686_v38  ;;  %v202_v40 = vmul.f32 %v170_v37, %v102_v21  ;;  %v100_v15 = vpop.permute.xlu0 %99  ;;  %v155_v11 = vmul.f32 %v795_v1, %v473_v12  ;;  %v203_v38 = vmul.f32 %v797_v62, %v648_v52 }
  0x96   :  { %v201_v53 = vmul.f32 %v790_v33, %v100_v15  ;;  %232 = vst [vmem:[%s930_s3 + $0x24] sm:$0xf] %v216_v13  ;;  %v125_v12 = vperm.slane %v41_v8, 0  ;;  %v822_v52 = vperm.slane %v40_v18, 0  ;;  %v827_v56 = vperm.slane %v60_v35, 0 }
  0x97   :  { %v324_v50 = vadd.f32 %v308_v9, %v292_v7  ;;  %v218_v63 = vadd.f32 %v202_v40, %v154_v43  ;;  %v219_v0 = vadd.f32 %v203_v38, %v155_v11  ;;  %v173_v7 = vperm.slane %v61_v14, 0 }
  0x98   :  { %v217_v3 = vadd.f32 %v201_v53, %v153_v39  ;;  %v943_v8 = vperm.slane %v659_v60, 0  ;;  %v157_v44 = vmul.f32 %v125_v12, %v499_v16  ;;  %v156_v9 = vmul.f32 %v822_v52, %v504_v17 }
  0x99   :  { %340 = vst [vmem:[%s931_s4 + $0xa] sm:$0x3] %v324_v50  ;;  %v298_v17 = vmul.f32 %v578_v27, %v736_v41  ;;  %v944_v18 = vperm.slane %v634_v42, 0  ;;  %v945_v38 = vperm.slane %v640_v46, 0  ;;  %v301_v27 = vmul.f32 %v599_v30, %v125_v12 }
  0x9a   :  { %234 = vst [vmem:[%s930_s3 + $0x2c] sm:$0xf] %v218_v63  ;;  %v295_v10 = vmul.f32 %v557_v24, %v943_v8  ;;  %v291_v46 = vmul.f32 %v541_v22, %v679_v49  ;;  %v290_v41 = vmul.f32 %v546_v23, %v733_v58  ;;  %v294_v23 = vmul.f32 %v562_v25, %v697_v2 }
  0x9b   :  { %233 = vst [vmem:[%s930_s3 + $0x28] sm:$0xf] %v217_v3  ;;  %v287_v11 = vmul.f32 %v525_v20, %v944_v18  ;;  %v297_v25 = vmul.f32 %v583_v28, %v760_v36  ;;  %v300_v28 = vmul.f32 %v604_v31, %v822_v52  ;;  %v947_v31 = vld [vmem:[#allocation4_spill] sm:$0xff]  ;;  %v948_v52 = vld [vmem:[#allocation3_spill] sm:$0xff] }
  0x9c   :  { %v272_v34 = vpop.permute.xlu2 %271  ;;  %v108_v6 = vpop.permute.xlu1 %107  ;;  %235 = vst [vmem:[%s930_s3 + $0x30] sm:$0xf] %v219_v0 }
  0x9d   :  { %v311_v32 = vmul.f32 %v272_v34, %v167_v61  ;;  %v205_v21 = vmul.f32 %v173_v7, %v108_v6  ;;  %v106_v43 = vpop.permute.xlu0 %105 }
  0x9e   :  { %v204_v40 = vmul.f32 %v827_v56, %v106_v43 }
  0x9f   :  { %v327_v39 = vadd.f32 %v311_v32, %v295_v10  ;;  %v221_v15 = vadd.f32 %v205_v21, %v157_v44  ;;  %v949_v21 = vld [vmem:[#allocation5_spill] sm:$0xff] }
  0xa0   :  { %v220_v13 = vadd.f32 %v204_v40, %v156_v9 }
  0xa1   :  { %343 = vst [vmem:[%s931_s4 + $0x10] sm:$0x3] %v327_v39 }
  0xa2   :  { %237 = vst [vmem:[%s930_s3 + $0x38] sm:$0xf] %v221_v15 }
  0xa3   :  { %236 = vst [vmem:[%s930_s3 + $0x34] sm:$0xf] %v220_v13 }
  0xa4   :  { %v278_v16 = vpop.permute.xlu2 %277  ;;  %v258_v24 = vpop.permute.xlu1 %257 }
  0xa5   :  { %v314_v60 = vmul.f32 %v278_v16, %v170_v37  ;;  %v304_v61 = vmul.f32 %v258_v24, %v646_v51  ;;  %v256_v53 = vpop.permute.xlu0 %255 }
  0xa6   :  { %v303_v50 = vmul.f32 %v256_v53, %v945_v38 }
  0xa7   :  { %v330_v63 = vadd.f32 %v314_v60, %v298_v17  ;;  %v320_v14 = vadd.f32 %v304_v61, %v288_v4 }
  0xa8   :  { %v319_v3 = vadd.f32 %v303_v50, %v287_v11 }
  0xa9   :  { %346 = vst [vmem:[%s931_s4 + $0x16] sm:$0x3] %v330_v63 }
  0xaa   :  { %336 = vst [vmem:[%s931_s4 + $0x2] sm:$0x3] %v320_v14 }
  0xab   :  { %335 = vst [vmem:[%s931_s4] sm:$0x3] %v319_v3 }
  0xac   :  { %v284_v19 = vpop.permute.xlu2 %283  ;;  %v264_v20 = vpop.permute.xlu1 %263 }
  0xad   :  { %v317_v42 = vmul.f32 %v284_v19, %v173_v7  ;;  %v307_v48 = vmul.f32 %v264_v20, %v690_v57  ;;  %v262_v51 = vpop.permute.xlu0 %261  ;;  %v293_v57 = vmul.f32 %v567_v26, %v751_v5  ;;  %v296_v26 = vmul.f32 %v588_v29, %v769_v47  ;;  %v946_v29 = vld [vmem:[#allocation2_spill] sm:$0xff] }
  0xae   :  { %v306_v37 = vmul.f32 %v262_v51, %v739_v45  ;;  %v299_v47 = vmul.f32 %v946_v29, %v795_v1 }
  0xaf   :  { %v333_v35 = vadd.f32 %v317_v42, %v301_v27  ;;  %v323_v0 = vadd.f32 %v307_v48, %v291_v46 }
  0xb0   :  { %v322_v34 = vadd.f32 %v306_v37, %v290_v41 }
  0xb1   :  { %349 = vst [vmem:[%s931_s4 + $0x1c] sm:$0x3] %v333_v35 }
  0xb2   :  { %339 = vst [vmem:[%s931_s4 + $0x8] sm:$0x3] %v323_v0 }
  0xb3   :  { %338 = vst [vmem:[%s931_s4 + $0x6] sm:$0x3] %v322_v34 }
  0xb4   :  { %v270_v22 = vpop.permute.xlu1 %269 }
  0xb5   :  { %v310_v30 = vmul.f32 %v270_v22, %v712_v54  ;;  %v268_v49 = vpop.permute.xlu0 %267 }
  0xb6   :  { %v309_v58 = vmul.f32 %v268_v49, %v756_v55 }
  0xb7   :  { %v326_v45 = vadd.f32 %v310_v30, %v294_v23 }
  0xb8   :  { %v325_v12 = vadd.f32 %v309_v58, %v293_v57 }
  0xb9   :  { %342 = vst [vmem:[%s931_s4 + $0xe] sm:$0x3] %v326_v45 }
  0xba   :  { %341 = vst [vmem:[%s931_s4 + $0xc] sm:$0x3] %v325_v12 }
  0xbc   :  { %v276_v7 = vpop.permute.xlu1 %275 }
  0xbd   :  { %v313_v2 = vmul.f32 %v276_v7, %v790_v33  ;;  %v274_v54 = vpop.permute.xlu0 %273 }
  0xbe   :  { %v312_v5 = vmul.f32 %v274_v54, %v771_v59 }
  0xbf   :  { %v329_v55 = vadd.f32 %v313_v2, %v297_v25 }
  0xc0   :  { %v328_v6 = vadd.f32 %v312_v5, %v296_v26 }
  0xc1   :  { %345 = vst [vmem:[%s931_s4 + $0x14] sm:$0x3] %v329_v55 }
  0xc2   :  { %344 = vst [vmem:[%s931_s4 + $0x12] sm:$0x3] %v328_v6 }
  0xc4   :  { %v282_v8 = vpop.permute.xlu1 %281 }
  0xc5   :  { %v316_v36 = vmul.f32 %v282_v8, %v827_v56  ;;  %v280_v33 = vpop.permute.xlu0 %279  ;;  %v302_v56 = vmul.f32 %v948_v52, %v947_v31 }
  0xc6   :  { %v315_v59 = vmul.f32 %v280_v33, %v797_v62 }
  0xc7   :  { %v332_v10 = vadd.f32 %v316_v36, %v300_v28 }
  0xc8   :  { %v331_v32 = vadd.f32 %v315_v59, %v299_v47 }
  0xc9   :  { %348 = vst [vmem:[%s931_s4 + $0x1a] sm:$0x3] %v332_v10 }
  0xca   :  { %347 = vst [vmem:[%s931_s4 + $0x18] sm:$0x3] %v331_v32 }
  0xcd   :  { %v286_v44 = vpop.permute.xlu0 %285 }
  0xce   :  { %v318_v43 = vmul.f32 %v286_v44, %v949_v21 }
  0xd0   :  { %v334_v9 = vadd.f32 %v318_v43, %v302_v56 }
  0xd2   :  { %350 = vst [vmem:[%s931_s4 + $0x1e] sm:$0x3] %v334_v9 }

</bundles_post_ra>
